<compile_context>
chip_gen: v7x
topology: tpu7x:2x2x1
jax: 0.10.0
libtpu: 0.0.40
codegen_flags: <defaults>
</compile_context>

<pallas_src>
import functools

import jax
import jax.numpy as jnp
from jax.experimental import pallas as pl
from jax.experimental.pallas import tpu as pltpu


# ------------------------------------------------------------------ helpers
def _erf(x):
    # Abramowitz & Stegun 7.1.26, max abs error 1.5e-7 (f32-exact in practice).
    a1, a2, a3, a4, a5 = (0.254829592, -0.284496736, 1.421413741,
                          -1.453152027, 1.061405429)
    p = 0.3275911
    s = jnp.sign(x)
    ax = jnp.abs(x)
    t = 1.0 / (1.0 + p * ax)
    poly = ((((a5 * t + a4) * t + a3) * t + a2) * t + a1) * t
    return s * (1.0 - poly * jnp.exp(-ax * ax))


def _gelu(x):
    # exact GELU: 0.5 * x * (1 + erf(x / sqrt(2)))  (matches torch.nn.GELU())
    return 0.5 * x * (1.0 + _erf(x * 0.7071067811865476))


def _pick_tile(n, candidates):
    for c in candidates:
        if n % c == 0:
            return c
    return n


# ------------------------------------------------------------------ kernels
def qkv_lif_kernel(x_ref, w_ref, o_ref):
    """qkv Linear (bias=False) + MultiStepLIF for one (token-tile, column-tile).

    Grid = (token tiles, 3C column tiles), both "parallel"; the LIF time axis
    (= batch B) is a sequential fori_loop with the membrane as loop carry,
    whose size is only (TN, TC3).  Spikes are exactly {0,1} and stored as
    int8 (bit-exact, 1 byte/elem of HBM traffic for the big intermediate).
    """
    B = x_ref.shape[0]
    w = w_ref[...]                                        # (C, TC3) bf16, once

    def body(b, v):
        cur = jnp.dot(x_ref[b], w,
                      preferred_element_type=jnp.float32)        # (TN, TC3) f32
        # LIF charge (decay_input, tau=2, v_reset=0): v <- v + (cur - v)/tau
        v = v + (cur - v) * 0.5
        spike = v >= 1.0                                  # heaviside(v - v_th)
        o_ref[b] = spike.astype(jnp.int8)
        return jnp.where(spike, 0.0, v)                   # hard reset to 0

    jax.lax.fori_loop(0, B, body, jnp.zeros(o_ref.shape[1:], jnp.float32))


def encoder_kernel(x_ref, qkvq_ref, qkvkv_ref, wp_ref, bp_ref,
                   w1_ref, b1_ref, w2_ref, b2_ref, o_ref, ctx_ref,
                   *, num_heads, scale):
    """Fused per (batch, query-tile): attention + proj + residual + MLP + residual.

    q/k/v for head h are static lane slices of the packed spike blocks
    (head-major layout, identical to the reference reshape/permute).  Each
    head's context is written into the head-major (TQ, C) VMEM scratch, then
    ONE K=C projection matmul replaces H rank-d accumulations.
    """
    C = wp_ref.shape[0]
    d = C // num_heads

    # int8 {0,1} spikes -> bf16 once per block (cheap VPU convert, then the
    # per-head slices are taken from bf16 values).
    q_rows = qkvq_ref[0].astype(jnp.bfloat16)             # (TQ, 3C)
    kv_rows = qkvkv_ref[0].astype(jnp.bfloat16)           # (N,  3C)

    # NOTE: at realistic shapes with d < 128, pad head_dim to 128 in the qkv
    # layout so these lane slices stay vreg-aligned; the per-head (TQ, N)
    # score/prob temporaries die at the ctx_ref store, so only one head's
    # intermediates are live at a time.
    for h in range(num_heads):
        # scale folded into q: N*d multiplies instead of H*N^2 (exact when d
        # is a power of 4, i.e. scale a power of two; ~2^-9 rel. err otherwise).
        qh = q_rows[:, h * d:(h + 1) * d] * scale                    # (TQ, d)
        kh = kv_rows[:, C + h * d:C + (h + 1) * d]                   # (N,  d)
        vh = kv_rows[:, 2 * C + h * d:2 * C + (h + 1) * d]           # (N,  d)
        # q @ k^T without an explicit transpose (contracting-dim dot_general).
        s = jax.lax.dot_general(qh, kh, (((1,), (1,)), ((), ())),
                                preferred_element_type=jnp.float32)  # (TQ, N)
        # spikes are {0,1} so s <= sqrt(d): exp() cannot overflow -> no row-max.
        p = jnp.exp(s)
        p = p * pl.reciprocal(jnp.sum(p, axis=-1, keepdims=True), approx=True)
        ctx_ref[:, h * d:(h + 1) * d] = jnp.dot(
            p.astype(jnp.bfloat16), vh, preferred_element_type=jnp.float32)

    # One full-depth (K=C) projection matmul over the head-major context.
    y = x_ref[0] + bp_ref[...] + jnp.dot(
        ctx_ref[...].astype(jnp.bfloat16), wp_ref[...],
        preferred_element_type=jnp.float32)                          # x + attn(x)
    h1 = _gelu(jnp.dot(y.astype(jnp.bfloat16), w1_ref[...],
                       preferred_element_type=jnp.float32) + b1_ref[...])
    m = _gelu(jnp.dot(h1.astype(jnp.bfloat16), w2_ref[...],
                      preferred_element_type=jnp.float32) + b2_ref[...])
    o_ref[0] = y + m                                                 # y + mlp(y)


# ------------------------------------------------------------------ wrapper
def transformer_encoder_forward(x, params, num_heads):
    B, N, C = x.shape
    d = C // num_heads
    scale = float(d) ** (-0.5)
    Hid = params["w1"].shape[0]

    # PyTorch (out, in) -> (in, out); bf16 weights, f32 biases / accumulation.
    wqkv_t = params["wqkv"].T.astype(jnp.bfloat16)       # (C, 3C)
    wp_t = params["wp"].T.astype(jnp.bfloat16)           # (C, C)
    w1_t = params["w1"].T.astype(jnp.bfloat16)           # (C, Hid)
    w2_t = params["w2"].T.astype(jnp.bfloat16)           # (Hid, C)
    bp = params["bp"].reshape(1, C).astype(jnp.float32)
    b1 = params["b1"].reshape(1, Hid).astype(jnp.float32)
    b2 = params["b2"].reshape(1, C).astype(jnp.float32)

    # x is only ever a bf16 MXU operand in kernel 1 -> cast once in the
    # wrapper (bit-identical to an in-kernel astype, half the input DMA).
    x_bf16 = x.astype(jnp.bfloat16)

    # Scoped-VMEM budget: fits v7x's 64 MiB physical VMEM (v5e/v6e have 128).
    vmem_cap = 64 * 1024 * 1024

    # --- kernel 1: qkv Linear + MultiStepLIF (token x column tiles) ---------
    TN = _pick_tile(N, (256, 128))
    TC3 = _pick_tile(3 * C, (512, 384, 256, 128))

    qkv_spk = pl.pallas_call(
        qkv_lif_kernel,
        out_shape=jax.ShapeDtypeStruct((B, N, 3 * C), jnp.int8),
        grid_spec=pltpu.PrefetchScalarGridSpec(
            num_scalar_prefetch=0,
            grid=(N // TN, (3 * C) // TC3),
            in_specs=[pl.BlockSpec((B, TN, C), lambda t, c: (0, t, 0)),
                      pl.BlockSpec((C, TC3), lambda t, c: (0, c))],
            out_specs=pl.BlockSpec((B, TN, TC3), lambda t, c: (0, t, c))),
        compiler_params=pltpu.CompilerParams(
            dimension_semantics=("parallel", "parallel"),
            vmem_limit_bytes=vmem_cap),
    )(x_bf16, wqkv_t)

    # --- kernel 2: fused attention + proj + residual + MLP + residual -------
    TQ = _pick_tile(N, (256, 128))

    def _const_spec(shape):
        # Weight/bias blocks never change across the grid -> single-buffer.
        return pl.BlockSpec(shape, lambda b, qi: (0, 0),
                            pipeline_mode=pl.Buffered(buffer_count=1))

    out = pl.pallas_call(
        functools.partial(encoder_kernel, num_heads=num_heads, scale=scale),
        out_shape=jax.ShapeDtypeStruct((B, N, C), jnp.float32),
        grid_spec=pltpu.PrefetchScalarGridSpec(
            num_scalar_prefetch=0,
            grid=(B, N // TQ),
            in_specs=[
                pl.BlockSpec((1, TQ, C), lambda b, qi: (b, qi, 0)),     # x residual
                pl.BlockSpec((1, TQ, 3 * C), lambda b, qi: (b, qi, 0)),  # q rows
                pl.BlockSpec((1, N, 3 * C), lambda b, qi: (b, 0, 0)),    # k/v rows
                _const_spec((C, C)),      # proj W^T
                _const_spec((1, C)),      # proj b
                _const_spec((C, Hid)),    # fc1 W^T
                _const_spec((1, Hid)),    # fc1 b
                _const_spec((Hid, C)),    # fc2 W^T
                _const_spec((1, C)),      # fc2 b
            ],
            out_specs=pl.BlockSpec((1, TQ, C), lambda b, qi: (b, qi, 0)),
            scratch_shapes=[pltpu.VMEM((TQ, C), jnp.float32)]),          # ctx
        compiler_params=pltpu.CompilerParams(
            dimension_semantics=("parallel", "parallel"),
            vmem_limit_bytes=vmem_cap),
    )(x, qkv_spk, qkv_spk, wp_t, bp, w1_t, b1, w2_t, b2)

    return out


# ------------------------------------------------------------------ main
if __name__ == "__main__":
    key = jax.random.PRNGKey(0)
    B, N, dim, num_heads = 2, 8, 32, 4
    Hid = int(dim * 4.0)

    ks = jax.random.split(key, 8)

    def _uniform(k, shape, fan_in):
        bound = 1.0 / (fan_in ** 0.5)
        return jax.random.uniform(k, shape, jnp.float32, -bound, bound)

    # Deterministic synthetic parameters (PyTorch-default-style uniform init).
    # Linear weights kept in PyTorch (out_features, in_features) convention.
    params = {
        "wqkv": _uniform(ks[1], (3 * dim, dim), dim),   # qkv Linear, bias=False
        "wp":   _uniform(ks[2], (dim, dim), dim),       # attention proj
        "bp":   _uniform(ks[3], (dim,), dim),
        "w1":   _uniform(ks[4], (Hid, dim), dim),       # mlp fc1
        "b1":   _uniform(ks[5], (Hid,), dim),
        "w2":   _uniform(ks[6], (dim, Hid), Hid),       # mlp fc2
        "b2":   _uniform(ks[7], (dim,), Hid),
    }

    # Scale input up a bit so the LIF neuron actually emits some spikes.
    x = 3.0 * jax.random.normal(ks[0], (B, N, dim), jnp.float32)

    out = transformer_encoder_forward(x, params, num_heads)
    out = jax.block_until_ready(out)

    assert out.shape == (B, N, dim) and out.dtype == jnp.float32
    assert bool(jnp.all(jnp.isfinite(out)))
    print("KERNEL_OK")
</pallas_src>

<mosaic_0001>
module attributes {stable_mosaic.version = 11 : i64} {
  func.func @qkv_lif_kernel(%arg0: i32, %arg1: i32, %arg2: memref<2x8x32xbf16, #tpu.memory_space<vmem>>, %arg3: memref<32x96xbf16, #tpu.memory_space<vmem>>, %arg4: memref<2x8x96xi8, #tpu.memory_space<vmem>>) attributes {dimension_semantics = [#tpu.dimension_semantics<parallel>, #tpu.dimension_semantics<parallel>], iteration_bounds = array<i64: 1, 1>, scalar_prefetch = 0 : i64, scratch_operands = 0 : i64, tpu.core_type = #tpu.core_type<tc>, window_params = [{transform_indices = @transform_0, window_bounds = array<i64: 2, 8, 32>}, {transform_indices = @transform_1, window_bounds = array<i64: 32, 96>}, {transform_indices = @transform_2, window_bounds = array<i64: 2, 8, 96>}]} {
    %c0 = arith.constant 0 : index
    %c0_0 = arith.constant 0 : index
    %0 = vector.load %arg3[%c0, %c0_0] : memref<32x96xbf16, #tpu.memory_space<vmem>>, vector<32x96xbf16>
    %cst = arith.constant 0.000000e+00 : f32
    %1 = vector.broadcast %cst : f32 to vector<8x96xf32>
    %c0_i32 = arith.constant 0 : i32
    %c2_i32 = arith.constant 2 : i32
    %2 = arith.addi %c0_i32, %c2_i32 : i32
    %c1_i32 = arith.constant 1 : i32
    %3 = scf.for %arg5 = %c0_i32 to %2 step %c1_i32 iter_args(%arg6 = %1) -> (vector<8x96xf32>)  : i32 {
      %4 = arith.index_cast %arg5 : i32 to index
      %c0_2 = arith.constant 0 : index
      %c0_3 = arith.constant 0 : index
      %5 = vector.load %arg2[%4, %c0_2, %c0_3] : memref<2x8x32xbf16, #tpu.memory_space<vmem>>, vector<1x8x32xbf16>
      %6 = vector.shape_cast %5 : vector<1x8x32xbf16> to vector<8x32xbf16>
      %cst_4 = arith.constant dense<0.000000e+00> : vector<8x96xf32>
      %7 = tpu.matmul %6, %0, %cst_4 {dimension_numbers = #tpu.dot_dimension_numbers<[1], [0], [0], [1], [0, 0, 1, 1], [], []>} : vector<8x32xbf16>, vector<32x96xbf16>, vector<8x96xf32> -> vector<8x96xf32>
      %8 = arith.subf %7, %arg6 : vector<8x96xf32>
      %cst_5 = arith.constant 5.000000e-01 : f32
      %9 = vector.broadcast %cst_5 : f32 to vector<8x96xf32>
      %10 = arith.mulf %8, %9 : vector<8x96xf32>
      %11 = arith.addf %arg6, %10 : vector<8x96xf32>
      %cst_6 = arith.constant 1.000000e+00 : f32
      %12 = vector.broadcast %cst_6 : f32 to vector<8x96xf32>
      %13 = arith.cmpf oge, %11, %12 : vector<8x96xf32>
      %14 = arith.extui %13 : vector<8x96xi1> to vector<8x96xi8>
      %15 = arith.index_cast %arg5 : i32 to index
      %c0_7 = arith.constant 0 : index
      %c0_8 = arith.constant 0 : index
      %16 = vector.load %arg4[%15, %c0_7, %c0_8] : memref<2x8x96xi8, #tpu.memory_space<vmem>>, vector<1x8x96xi8>
      %17 = vector.shape_cast %16 : vector<1x8x96xi8> to vector<8x96xi8>
      %18 = vector.shape_cast %14 : vector<8x96xi8> to vector<1x8x96xi8>
      tpu.vector_store %arg4[%15, %c0_7, %c0_8], %18 {strides = array<i32>} : memref<2x8x96xi8, #tpu.memory_space<vmem>>, vector<1x8x96xi8>,
      %cst_9 = arith.constant 0.000000e+00 : f32
      %19 = vector.broadcast %cst_9 : f32 to vector<8x96xf32>
      %20 = arith.select %13, %19, %11 : vector<8x96xi1>, vector<8x96xf32>
      scf.yield %20 : vector<8x96xf32>
    }
    %c2_i32_1 = arith.constant 2 : i32
    return
  }
  func.func @transform_0(%arg0: i32, %arg1: i32) -> (i32, i32, i32) {
    %c0_i32 = arith.constant 0 : i32
    %c0_i32_0 = arith.constant 0 : i32
    %c0_i32_1 = arith.constant 0 : i32
    return %c0_i32, %arg0, %c0_i32_0 : i32, i32, i32
  }
  func.func @transform_1(%arg0: i32, %arg1: i32) -> (i32, i32) {
    %c0_i32 = arith.constant 0 : i32
    %c0_i32_0 = arith.constant 0 : i32
    return %c0_i32, %arg1 : i32, i32
  }
  func.func @transform_2(%arg0: i32, %arg1: i32) -> (i32, i32, i32) {
    %c0_i32 = arith.constant 0 : i32
    %c0_i32_0 = arith.constant 0 : i32
    return %c0_i32, %arg0, %arg1 : i32, i32, i32
  }
}

</mosaic_0001>

<bundles_post_ra>
// kernel: tpu_custom_call.1
= control target key start
LH: loop header
LB: loop body
LE: loop exit
PB: predicated region body
PF: predicated region fallthrough
CT: control target
= control target key end

     0   :  { %7 = vsyncpa [#allocation3], 0  ;;  %s356_s0 = inlined_call_operand.hbm [shape: bf16[2,8,32], index: 0, kind: input, shape index: {}]   ;;  %s357_s1 = inlined_call_operand.hbm [shape: bf16[32,96], index: 1, kind: input, shape index: {}]   ;;  %s358_s2 = inlined_call_operand.hbm [shape: s8[2,8,96], index: 2, kind: output, shape index: {}]  }
   0x1   :  { %8 = vsyncpa [#allocation6], 0 }
   0x2   :  { %9 = vsyncpa [#allocation4], 0  ;;  %s285_s9 = smov [#allocation2]   ;;  %s197_s13 = scalar_lea.hbm %s356_s0, 128 }
   0x3   :  { %s15_s10 = sshll.u32 %s285_s9, 4  ;;  %p198_p0 = scmp.ne.s32.totalorder %s356_s0, %s197_s13  ;;  %s16_s10 = int_to_ptr.vmem [resolvable:$true] %s15_s10 }
   0x4   :  { %p201_p1 = scmp.lt.u32.totalorder %s197_s13, %s356_s0 }
   0x6   :  { %p203_p2 = pnand %p201_p1, %p198_p0 }
   0x8   :  { %206 = shalt.err (!%p203_p2)
}
   0x9   :  { %s207_s18 = scalar_lea.vmem %s16_s10, 128  ;;  %p212_p4 = scmp.lt.s32.totalorder %s16_s10, %s16_s10 }
   0xa   :  { %p208_p3 = scmp.ne.s32.totalorder %s16_s10, %s207_s18  ;;  %p213_p5 = scmp.lt.s32.totalorder %s207_s18, %s207_s18 }
   0xc   :  { %p214_p6 = por %p213_p5, %p212_p4 }
   0xe   :  { %p215_p7 = pnand %p214_p6, %p208_p3 }
  0x10   :  { %218 = shalt.err (!%p215_p7)
}
  0x11   :  { %s286_s19 = smov 64   ;;  %s287_s20 = smov 4  }
  0x12   :  { %21 = dma.hbm_to_vmem [thread:$0]  %s356_s0, 128, %s16_s10, [#allocation3], %s286_s19, %s286_s19, %s287_s20  }
  0x13   :  { %s288_s23 = smov [#allocation5]   ;;  %s219_s27 = scalar_lea.hbm %s357_s1, 256 }
  0x14   :  { %s27_s24 = sshll.u32 %s288_s23, 4  ;;  %p220_p8 = scmp.ne.s32.totalorder %s357_s1, %s219_s27  ;;  %s28_s24 = int_to_ptr.vmem [resolvable:$true] %s27_s24 }
  0x15   :  { %p223_p9 = scmp.lt.u32.totalorder %s219_s27, %s357_s1 }
  0x17   :  { %p225_p10 = pnand %p223_p9, %p220_p8 }
  0x19   :  { %228 = shalt.err (!%p225_p10)
}
  0x1a   :  { %s229_s4 = scalar_lea.vmem %s28_s24, 256  ;;  %p234_p12 = scmp.lt.s32.totalorder %s28_s24, %s28_s24 }
  0x1b   :  { %p230_p11 = scmp.ne.s32.totalorder %s28_s24, %s229_s4  ;;  %p235_p13 = scmp.lt.s32.totalorder %s229_s4, %s229_s4 }
  0x1d   :  { %p236_p0 = por %p235_p13, %p234_p12 }
  0x1f   :  { %p237_p1 = pnand %p236_p0, %p230_p11 }
  0x21   :  { %240 = shalt.err (!%p237_p1)
}
  0x22   :  { %33 = dma.hbm_to_vmem [thread:$0]  %s357_s1, 256, %s28_s24, [#allocation6], %s286_s19, %s286_s19, %s287_s20  }
  0x23   :  { %271 = dma.done.wait [#allocation3], 128  }
  0x24   :  { %272 = vsyncadd [#allocation3], 4294967168 }
  0x25   :  { %273 = dma.done.wait [#allocation6], 256  }
  0x26   :  { %274 = vsyncadd [#allocation6], 4294967040  ;;  %v43_v0 = vld [vmem:[#allocation5] sm:$0xf]  ;;  %v44_v1 = vld [vmem:[#allocation5 + $0x4] sm:$0xf] }
  0x27   :  { %v45_v2 = vld [vmem:[#allocation5 + $0x8] sm:$0xf]  ;;  %v46_v3 = vld [vmem:[#allocation5 + $0xc] sm:$0xf]  ;;  %v277_v4 = vmov 0.0   ;;  %s334_s6 = smov 0  }
  0x28 LB: > { %v156_v5 = vcombine.low %v43_v0, %v44_v1  ;;  %v289_v6 = vmov 0.0   ;;  %vm290_vm0 = vmmov 0   ;;  %v157_v7 = vcombine.low %v45_v2, %v46_v3  ;;  %s155_s1 = sshll.u32 %s283_s6, 2  ;;  %s159_s8 = sshll.u32 %s283_s6, 1  ;;  %s283_s6 = sphi %s334_s6, %s52_s6   ;;  %v279_v4 = vphi %v277_v4, %v124_v4  }
  0x29   : > { %163 = vmatprep.subr.bf16.mxu0 %v289_v6  ;;  %167 = vmatprep.mubr.msk.bf16.mxu0 %vm290_vm0, %v289_v6  ;;  %s55_s7 = scalar_lea.vmem [#allocation2], %s155_s1  ;;  %vm69_vm1 = vcmask 261120   ;;  %vm122_vm4 = vcmask 779264   ;;  %v291_v16 = vmov 0   ;;  %s121_s9 = scalar_lea.vmem [#allocation7], %s159_s8 }
  0x2a   : > { %164 = vmatpush3.bf16.msra.mxu0 %v156_v5  ;;  %v56_v8 = vld [vmem:[%s55_s7] sm:$0xf]  ;;  %s52_s6 = sadd.s32 1, %s283_s6  }
  0x2b   : > { %165 = vmatprep.subr.bf16.mxu0 %v289_v6  ;;  %p49_p2 = scmp.ge.s32.totalorder %s52_s6, 2  }
  0x2c   :  { %s292_s10 = smov (%p49_p2), [#allocation7]  }
  0x2d   :  { %s130_s11 = sshll.u32 (%p49_p2), %s292_s10, 4  ;;  %s131_s11 = int_to_ptr.vmem [resolvable:$true] %s130_s11 }
  0x2e   : > { %166 = vmatpush3.bf16.msra.mxu0 %v157_v7  ;;  %s241_s12 = scalar_lea.vmem (%p49_p2), %s131_s11, 64  ;;  %p246_p4 = scmp.lt.s32.totalorder (%p49_p2), %s131_s11, %s131_s11 }
  0x2f   :  { %p242_p3 = scmp.ne.s32.totalorder (%p49_p2), %s131_s11, %s241_s12  ;;  %p247_p5 = scmp.lt.s32.totalorder (%p49_p2), %s241_s12, %s241_s12 }
  0x31   : > { %168 = vmatmul.mubr.msk.bf16.vlgmr.msra.gmra.mrb[0].mxu0 %vm69_vm1, %v56_v8  ;;  %p248_p6 = por (%p49_p2), %p247_p5, %p246_p4 }
  0x33   :  { %p249_p7 = pnand (%p49_p2), %p248_p6, %p242_p3 }
 0x104   : > { %v107_v9 = vpop.f32.mrb[0].mxu0 }
 0x105   : > { %v113_v10 = vsub.f32 %v107_v9, %v279_v4  ;;  %v169_v11 = vpop.f32.mrb[1].mxu0 }
 0x106   : > { %v110_v12 = vpop.f32.mrb[2].mxu0 }
 0x107   : > { %v114_v13 = vmul.f32 0.5, %v113_v10  ;;  %v170_v14 = vpop.f32.mrb[3].mxu0 }
 0x109   : > { %v115_v15 = vadd.f32 %v279_v4, %v114_v13  ;;  %51 = sbr.rel (!%p49_p2) target bundleno = 40 (0x28), region = 45 }
 0x10b   : > { %vm116_vm2 = vcmp.ge.f32.partialorder %v115_v15, 1.0 }
 0x10c   : > { %vm117_vm3 = vmpackc.low %vm116_vm2, %vm116_vm2  ;;  %v124_v4 = vsel %vm116_vm2, 0.0, %v115_v15  }
 0x10d   : > { %vm118_vm5 = vmpackc.even %vm117_vm3, %vm117_vm3 }
 0x10e   : > { %v119_v17 = vsel %vm118_vm5, 16843009, %v291_v16 }
 0x10f   : > { %123 = vst.msk [vmem:[%s121_s9] sm:$0x3] %vm122_vm4, %v119_v17 }
 0x110   :  { %252 = shalt.err (!%p249_p7)
}
 0x111   :  { %s253_s15 = scalar_lea.hbm %s358_s2, 64 }
 0x112   :  { %p254_p8 = scmp.ne.s32.totalorder %s358_s2, %s253_s15  ;;  %p257_p9 = scmp.lt.u32.totalorder %s253_s15, %s358_s2 }
 0x114   :  { %p259_p10 = pnand %p257_p9, %p254_p8 }
 0x116   :  { %262 = shalt.err (!%p259_p10)
}
 0x117   :  { %s293_s20 = smov 32   ;;  %s294_s21 = smov 2  }
 0x118   :  { %136 = dma.vmem_to_hbm [thread:$0]  %s131_s11, 64, %s358_s2, [#allocation4], %s293_s20, %s293_s20, %s294_s21  }
 0x119   :  { %275 = dma.done.wait [#allocation4], 64  }
 0x11a   :  { %276 = vsyncadd [#allocation4], 4294967232 }
 0x11b   :  { %140 = vsyncpa [#allocation3], 1 }
 0x11c   :  { %141 = vsyncpa [#allocation6], 1 }
 0x11d   :  { %142 = vsyncpa [#allocation4], 1 }

</bundles_post_ra>
